<compile_context>
chip_gen: v7x
topology: tpu7x:2x2x1
jax: 0.10.0
libtpu: 0.0.40
codegen_flags: <defaults>
</compile_context>

<pallas_src>
import jax
import jax.numpy as jnp
from jax import lax
from jax.experimental import pallas as pl
from jax.experimental.pallas import tpu as pltpu


_VMEM_LIMIT = 32 * 1024 * 1024  # explicit scoped-VMEM limit (v5e default is 16 MiB)


def _round_up(x, m):
    return (x + m - 1) // m * m


def _pick_mn_tiles(M, Np):
    """Pick (tm, tn, Mp). tn=256 on the v6e/v7x MXU edge when Cout allows."""
    tn = 256 if (Np % 256 == 0) else 128
    tm = 256 if (_round_up(M, 128) % 256 == 0) else 128
    Mp = _round_up(M, tm)
    # Keep >=2 blocks along a "parallel" grid axis so v7x's two TensorCores both
    # get work (one extra ~0.35us grid step on single-TC chips — negligible).
    if (Mp // tm) * (Np // tn) < 2 and tm > 64:
        tm //= 2
        Mp = _round_up(M, tm)
    return tm, tn, Mp


# ---------------------------------------------------------------------------
# Fused GEMM + shift + ReLU:  out = relu(lhs @ rhs + shift)
# (conv taps & Cin folded into K; BN scale folded into rhs; shift = folded BN bias)
# ---------------------------------------------------------------------------
def _gemm_shift_relu_1k_kernel(lhs_ref, rhs_ref, shift_ref, o_ref):
    # Single contraction step: no accumulator scratch, no init/finalize.
    acc = jnp.dot(lhs_ref[...], rhs_ref[...], preferred_element_type=jnp.float32)
    o_ref[...] = jnp.maximum(acc + shift_ref[...], 0.0).astype(o_ref.dtype)


def _gemm_shift_relu_acc_kernel(lhs_ref, rhs_ref, shift_ref, o_ref, acc_ref):
    # Multi-K fallback (K tiled, f32 VMEM accumulator).
    @pl.when(pl.program_id(2) == 0)
    def _():
        acc_ref[...] = jnp.zeros_like(acc_ref)

    acc_ref[...] += jnp.dot(lhs_ref[...], rhs_ref[...],
                            preferred_element_type=jnp.float32)

    @pl.when(pl.program_id(2) == pl.num_programs(2) - 1)
    def _():
        o_ref[...] = jnp.maximum(acc_ref[...] + shift_ref[...],
                                 0.0).astype(o_ref.dtype)


def _gemm_shift_relu(lhs, rhs, shift, *, out_dtype=jnp.float32):
    """relu(lhs @ rhs + shift) with lane-dense tiling. lhs: (M,K), rhs: (K,N)."""
    M, K = lhs.shape
    K2, N = rhs.shape
    assert K == K2
    Kp = _round_up(K, 128)
    Np = _round_up(N, 128)
    tm, tn, Mp = _pick_mn_tiles(M, Np)

    # Collapse the contraction into one step whenever the block fits VMEM easily.
    if Kp <= 2048:
        tk = Kp
    elif Kp % 512 == 0:
        tk = 512
    elif Kp % 256 == 0:
        tk = 256
    else:
        tk = 128

    if (Mp, Kp) != (M, K):
        lhs = jnp.pad(lhs, ((0, Mp - M), (0, Kp - K)))
    if (Kp, Np) != (K, N):
        rhs = jnp.pad(rhs, ((0, Kp - K), (0, Np - N)))
    shift2d = jnp.pad(shift.reshape(1, N).astype(jnp.float32),
                      ((0, 0), (0, Np - N)))

    if tk == Kp:
        out = pl.pallas_call(
            _gemm_shift_relu_1k_kernel,
            out_shape=jax.ShapeDtypeStruct((Mp, Np), out_dtype),
            grid_spec=pltpu.PrefetchScalarGridSpec(
                num_scalar_prefetch=0,
                grid=(Mp // tm, Np // tn),
                in_specs=[
                    pl.BlockSpec((tm, Kp), lambda i, j: (i, 0)),
                    pl.BlockSpec((Kp, tn), lambda i, j: (0, j)),
                    pl.BlockSpec((1, tn), lambda i, j: (0, j)),
                ],
                out_specs=pl.BlockSpec((tm, tn), lambda i, j: (i, j)),
            ),
            compiler_params=pltpu.CompilerParams(
                dimension_semantics=("parallel", "parallel"),
                vmem_limit_bytes=_VMEM_LIMIT),
        )(lhs, rhs, shift2d)
    else:
        out = pl.pallas_call(
            _gemm_shift_relu_acc_kernel,
            out_shape=jax.ShapeDtypeStruct((Mp, Np), out_dtype),
            grid_spec=pltpu.PrefetchScalarGridSpec(
                num_scalar_prefetch=0,
                grid=(Mp // tm, Np // tn, Kp // tk),
                in_specs=[
                    pl.BlockSpec((tm, tk), lambda i, j, k: (i, k)),
                    pl.BlockSpec((tk, tn), lambda i, j, k: (k, j)),
                    pl.BlockSpec((1, tn), lambda i, j, k: (0, j)),
                ],
                out_specs=pl.BlockSpec((tm, tn), lambda i, j, k: (i, j)),
                scratch_shapes=[pltpu.VMEM((tm, tn), jnp.float32)],
            ),
            compiler_params=pltpu.CompilerParams(
                dimension_semantics=("parallel", "parallel", "arbitrary"),
                vmem_limit_bytes=_VMEM_LIMIT),
        )(lhs, rhs, shift2d)
    return out[:M, :N]


# ---------------------------------------------------------------------------
# BasicConv2d: Conv2d(bias=False) -> BatchNorm2d(eval) -> ReLU   (NHWC in/out)
# ---------------------------------------------------------------------------
def conv_bn_relu(x_nhwc, p, *, stride, padding, eps=1e-3, out_dtype=jnp.float32):
    N, H, W, Cin = x_nhwc.shape
    Cout, _, KH, KW = p["weight"].shape
    sh, sw = stride
    ph, pw = padding
    Ho = (H + 2 * ph - KH) // sh + 1
    Wo = (W + 2 * pw - KW) // sw + 1

    compute_dtype = jnp.bfloat16  # bf16 GEMM inputs, f32 accumulate/epilogue
    x = x_nhwc.astype(compute_dtype)
    xp = jnp.pad(x, ((0, 0), (ph, ph), (pw, pw), (0, 0))) if (ph or pw) else x

    K = KH * KW * Cin
    Kp = _round_up(K, 128)

    # Wrapper-side layout plumbing: fold the KH*KW taps into the contraction dim.
    # The K-dim zero pad is folded into the same concat (no second lhs pad/copy).
    cols = []
    for kh in range(KH):
        for kw in range(KW):
            cols.append(lax.slice(
                xp, (0, kh, kw, 0),
                (N, kh + (Ho - 1) * sh + 1, kw + (Wo - 1) * sw + 1, Cin),
                (1, sh, sw, 1)))
    if Kp > K:
        cols.append(jnp.zeros((N, Ho, Wo, Kp - K), compute_dtype))
    lhs = jnp.concatenate(cols, axis=-1).reshape(N * Ho * Wo, Kp)

    # Fold eval-mode BN into the GEMM: w' = w * scale ; epilogue adds shift.
    scale = p["gamma"] / jnp.sqrt(p["var"] + eps)            # (Cout,)
    shift = p["beta"] - p["mean"] * scale                    # (Cout,)
    w = jnp.transpose(p["weight"], (2, 3, 1, 0)).reshape(K, Cout) * scale[None, :]
    w = jnp.pad(w, ((0, Kp - K), (0, 0))).astype(compute_dtype)

    out2d = _gemm_shift_relu(lhs, w, shift, out_dtype=out_dtype)
    return out2d.reshape(N, Ho, Wo, Cout)


# ---------------------------------------------------------------------------
# Max-pool branch: F.max_pool2d(kernel_size=3, stride=2, padding=1)   (NHWC)
# ---------------------------------------------------------------------------
def _maxpool3_kernel(taps_ref, o_ref):
    # taps_ref: (3, tm, tc) column taps (rows already max-reduced); o_ref: (tm, tc)
    o_ref[...] = jnp.maximum(jnp.maximum(taps_ref[0], taps_ref[1]), taps_ref[2])


def max_pool2d_3x3_s2_p1(x_nhwc):
    N, H, W, C = x_nhwc.shape
    Ho = (H + 2 - 3) // 2 + 1
    Wo = (W + 2 - 3) // 2 + 1
    # finfo.min is equivalent to -inf under max (matches PyTorch's -inf padding).
    neg = jnp.finfo(x_nhwc.dtype).min
    xp = jnp.pad(x_nhwc, ((0, 0), (1, 1), (1, 1), (0, 0)), constant_values=neg)
    Wp = W + 2

    # Pre-reduce the kh (row) dimension wrapper-side -> only 3 taps to stack.
    rows = [lax.slice(xp, (0, kh, 0, 0),
                      (N, kh + (Ho - 1) * 2 + 1, Wp, C), (1, 2, 1, 1))
            for kh in range(3)]
    rowmax = jnp.maximum(jnp.maximum(rows[0], rows[1]), rows[2])   # (N, Ho, Wp, C)
    taps = [lax.slice(rowmax, (0, 0, kw, 0),
                      (N, Ho, kw + (Wo - 1) * 2 + 1, C), (1, 1, 2, 1))
            for kw in range(3)]
    M = N * Ho * Wo
    t = jnp.stack(taps, axis=0).reshape(3, M, C)

    Cp = _round_up(C, 128)
    tc = Cp if Cp <= 1024 else (512 if Cp % 512 == 0 else 128)
    Mp128 = _round_up(M, 128)
    if Mp128 % 512 == 0:
        tm = 512
    elif Mp128 % 256 == 0:
        tm = 256
    else:
        tm = 128
    Mp = _round_up(M, tm)
    if (Mp, Cp) != (M, C):
        t = jnp.pad(t, ((0, 0), (0, Mp - M), (0, Cp - C)), constant_values=neg)

    out = pl.pallas_call(
        _maxpool3_kernel,
        out_shape=jax.ShapeDtypeStruct((Mp, Cp), x_nhwc.dtype),
        grid_spec=pltpu.PrefetchScalarGridSpec(
            num_scalar_prefetch=0,
            grid=(Mp // tm, Cp // tc),
            in_specs=[pl.BlockSpec((3, tm, tc), lambda i, j: (0, i, j))],
            out_specs=pl.BlockSpec((tm, tc), lambda i, j: (i, j)),
        ),
        compiler_params=pltpu.CompilerParams(
            dimension_semantics=("parallel", "parallel"),
            vmem_limit_bytes=_VMEM_LIMIT),
    )(t)
    return out[:M, :C].reshape(N, Ho, Wo, C)


# ---------------------------------------------------------------------------
# InceptionD forward (NCHW in / NCHW out, matching the PyTorch module)
# ---------------------------------------------------------------------------
def inception_d_forward(x_nchw, params, eps=1e-3):
    x = jnp.transpose(x_nchw, (0, 2, 3, 1)).astype(jnp.float32)     # NHWC

    # Branch 1: 1x1 conv -> 3x3 stride-2 pad-1 conv  (intermediate stored bf16)
    b3 = conv_bn_relu(x, params["branch3x3_1"], stride=(1, 1), padding=(0, 0),
                      eps=eps, out_dtype=jnp.bfloat16)
    b3 = conv_bn_relu(b3, params["branch3x3_2"], stride=(2, 2), padding=(1, 1),
                      eps=eps, out_dtype=jnp.float32)

    # Branch 2: 1x1 -> 1x7 -> 7x1 -> 3x3 stride-2 pad-1  (intermediates bf16)
    b7 = conv_bn_relu(x, params["branch7x7x3_1"], stride=(1, 1), padding=(0, 0),
                      eps=eps, out_dtype=jnp.bfloat16)
    b7 = conv_bn_relu(b7, params["branch7x7x3_2"], stride=(1, 1), padding=(0, 3),
                      eps=eps, out_dtype=jnp.bfloat16)
    b7 = conv_bn_relu(b7, params["branch7x7x3_3"], stride=(1, 1), padding=(3, 0),
                      eps=eps, out_dtype=jnp.bfloat16)
    b7 = conv_bn_relu(b7, params["branch7x7x3_4"], stride=(2, 2), padding=(1, 1),
                      eps=eps, out_dtype=jnp.float32)

    # Branch 3: 3x3 stride-2 pad-1 max pool (kept f32, exact vs reference)
    bp = max_pool2d_3x3_s2_p1(x)

    out = jnp.concatenate([b3, b7, bp], axis=-1)                     # channel concat
    return jnp.transpose(out, (0, 3, 1, 2))                          # back to NCHW


# ---------------------------------------------------------------------------
# Pure-JAX reference (for the correctness check)
# ---------------------------------------------------------------------------
def _conv_bn_relu_ref(x_nhwc, p, stride, padding, eps):
    w_hwio = jnp.transpose(p["weight"], (2, 3, 1, 0))
    y = lax.conv_general_dilated(
        x_nhwc, w_hwio, window_strides=stride,
        padding=[(padding[0], padding[0]), (padding[1], padding[1])],
        dimension_numbers=("NHWC", "HWIO", "NHWC"),
        precision=lax.Precision.HIGHEST)
    inv = 1.0 / jnp.sqrt(p["var"] + eps)
    y = (y - p["mean"]) * inv * p["gamma"] + p["beta"]
    return jnp.maximum(y, 0.0)


def inception_d_ref(x_nchw, params, eps=1e-3):
    x = jnp.transpose(x_nchw, (0, 2, 3, 1)).astype(jnp.float32)
    b3 = _conv_bn_relu_ref(x, params["branch3x3_1"], (1, 1), (0, 0), eps)
    b3 = _conv_bn_relu_ref(b3, params["branch3x3_2"], (2, 2), (1, 1), eps)
    b7 = _conv_bn_relu_ref(x, params["branch7x7x3_1"], (1, 1), (0, 0), eps)
    b7 = _conv_bn_relu_ref(b7, params["branch7x7x3_2"], (1, 1), (0, 3), eps)
    b7 = _conv_bn_relu_ref(b7, params["branch7x7x3_3"], (1, 1), (3, 0), eps)
    b7 = _conv_bn_relu_ref(b7, params["branch7x7x3_4"], (2, 2), (1, 1), eps)
    bp = lax.reduce_window(x, jnp.array(-jnp.inf, x.dtype), lax.max,
                           (1, 3, 3, 1), (1, 2, 2, 1),
                           [(0, 0), (1, 1), (1, 1), (0, 0)])
    out = jnp.concatenate([b3, b7, bp], axis=-1)
    return jnp.transpose(out, (0, 3, 1, 2))


def _make_conv_params(key, cin, cout, kh, kw):
    kw_, kg, kb, km, kv = jax.random.split(key, 5)
    return {
        "weight": jax.random.normal(kw_, (cout, cin, kh, kw), jnp.float32) * 0.1,
        "gamma": 1.0 + 0.1 * jax.random.normal(kg, (cout,), jnp.float32),
        "beta": 0.1 * jax.random.normal(kb, (cout,), jnp.float32),
        "mean": 0.1 * jax.random.normal(km, (cout,), jnp.float32),
        "var": 1.0 + jnp.abs(jax.random.normal(kv, (cout,), jnp.float32)),
    }


if __name__ == "__main__":
    key = jax.random.PRNGKey(0)
    keys = jax.random.split(key, 7)

    # Small shapes consistent with the module (real InceptionD would use
    # in_channels=768, interm=192, out=320/192 at 17x17 spatial).
    N, Cin, H, W = 2, 4, 16, 16
    i1, i2, o1, o2 = 16, 16, 32, 16

    x = jax.random.normal(keys[0], (N, Cin, H, W), dtype=jnp.float32)
    params = {
        "branch3x3_1":   _make_conv_params(keys[1], Cin, i1, 1, 1),
        "branch3x3_2":   _make_conv_params(keys[2], i1, o1, 3, 3),
        "branch7x7x3_1": _make_conv_params(keys[3], Cin, i2, 1, 1),
        "branch7x7x3_2": _make_conv_params(keys[4], i2, i2, 1, 7),
        "branch7x7x3_3": _make_conv_params(keys[5], i2, i2, 7, 1),
        "branch7x7x3_4": _make_conv_params(keys[6], i2, o2, 3, 3),
    }

    fwd = jax.jit(inception_d_forward)
    out = jax.block_until_ready(fwd(x, params))

    ref = inception_d_ref(x, params)
    assert out.shape == (N, o1 + o2 + Cin, H // 2, W // 2), out.shape
    # bf16 GEMM inputs / bf16 intermediates vs an f32 HIGHEST-precision reference:
    # expected ~1e-2 relative error, so a looser tolerance is used.
    assert jnp.allclose(out, ref, atol=5e-2, rtol=5e-2), "mismatch vs reference"

    print("KERNEL_OK")
</pallas_src>

<mosaic_0001>
module attributes {stable_mosaic.version = 11 : i64} {
  func.func @_gemm_shift_relu_1k_kernel(%arg0: i32, %arg1: i32, %arg2: memref<256x128xbf16, #tpu.memory_space<vmem>>, %arg3: memref<128x128xbf16, #tpu.memory_space<vmem>>, %arg4: memref<1x128xf32, #tpu.memory_space<vmem>>, %arg5: memref<256x128xbf16, #tpu.memory_space<vmem>>) attributes {dimension_semantics = [#tpu.dimension_semantics<parallel>, #tpu.dimension_semantics<parallel>], iteration_bounds = array<i64: 2, 1>, scalar_prefetch = 0 : i64, scratch_operands = 0 : i64, tpu.core_type = #tpu.core_type<tc>, window_params = [{transform_indices = @transform_0, window_bounds = array<i64: 256, 128>}, {transform_indices = @transform_1, window_bounds = array<i64: 128, 128>}, {transform_indices = @transform_2, window_bounds = array<i64: 1, 128>}, {transform_indices = @transform_3, window_bounds = array<i64: 256, 128>}]} {
    %c0 = arith.constant 0 : index
    %c0_0 = arith.constant 0 : index
    %0 = vector.load %arg2[%c0, %c0_0] : memref<256x128xbf16, #tpu.memory_space<vmem>>, vector<256x128xbf16>
    %c0_1 = arith.constant 0 : index
    %c0_2 = arith.constant 0 : index
    %1 = vector.load %arg3[%c0_1, %c0_2] : memref<128x128xbf16, #tpu.memory_space<vmem>>, vector<128x128xbf16>
    %cst = arith.constant dense<0.000000e+00> : vector<256x128xf32>
    %2 = tpu.matmul %0, %1, %cst {dimension_numbers = #tpu.dot_dimension_numbers<[1], [0], [0], [1], [0, 0, 1, 1], [], []>} : vector<256x128xbf16>, vector<128x128xbf16>, vector<256x128xf32> -> vector<256x128xf32>
    %c0_3 = arith.constant 0 : index
    %c0_4 = arith.constant 0 : index
    %3 = vector.load %arg4[%c0_3, %c0_4] : memref<1x128xf32, #tpu.memory_space<vmem>>, vector<1x128xf32>
    %4 = vector.broadcast %3 : vector<1x128xf32> to vector<256x128xf32>
    %5 = arith.addf %2, %4 : vector<256x128xf32>
    %cst_5 = arith.constant 0.000000e+00 : f32
    %6 = vector.broadcast %cst_5 : f32 to vector<256x128xf32>
    %7 = arith.maximumf %5, %6 : vector<256x128xf32>
    %8 = arith.truncf %7 : vector<256x128xf32> to vector<256x128xbf16>
    %c0_6 = arith.constant 0 : index
    %c0_7 = arith.constant 0 : index
    %9 = vector.load %arg5[%c0_6, %c0_7] : memref<256x128xbf16, #tpu.memory_space<vmem>>, vector<256x128xbf16>
    tpu.vector_store %arg5[%c0_6, %c0_7], %8 {strides = array<i32>} : memref<256x128xbf16, #tpu.memory_space<vmem>>, vector<256x128xbf16>,
    return
  }
  func.func @transform_0(%arg0: i32, %arg1: i32) -> (i32, i32) {
    %c0_i32 = arith.constant 0 : i32
    %c0_i32_0 = arith.constant 0 : i32
    return %arg0, %c0_i32 : i32, i32
  }
  func.func @transform_1(%arg0: i32, %arg1: i32) -> (i32, i32) {
    %c0_i32 = arith.constant 0 : i32
    %c0_i32_0 = arith.constant 0 : i32
    return %c0_i32, %arg1 : i32, i32
  }
  func.func @transform_2(%arg0: i32, %arg1: i32) -> (i32, i32) {
    %c0_i32 = arith.constant 0 : i32
    %c0_i32_0 = arith.constant 0 : i32
    return %c0_i32, %arg1 : i32, i32
  }
  func.func @transform_3(%arg0: i32, %arg1: i32) -> (i32, i32) {
    %c0_i32 = arith.constant 0 : i32
    return %arg0, %arg1 : i32, i32
  }
}

module attributes {stable_mosaic.version = 11 : i64} {
  func.func @_gemm_shift_relu_1k_kernel(%arg0: i32, %arg1: i32, %arg2: memref<64x256xbf16, #tpu.memory_space<vmem>>, %arg3: memref<256x128xbf16, #tpu.memory_space<vmem>>, %arg4: memref<1x128xf32, #tpu.memory_space<vmem>>, %arg5: memref<64x128xf32, #tpu.memory_space<vmem>>) attributes {dimension_semantics = [#tpu.dimension_semantics<parallel>, #tpu.dimension_semantics<parallel>], iteration_bounds = array<i64: 2, 1>, scalar_prefetch = 0 : i64, scratch_operands = 0 : i64, tpu.core_type = #tpu.core_type<tc>, window_params = [{transform_indices = @transform_0, window_bounds = array<i64: 64, 256>}, {transform_indices = @transform_1, window_bounds = array<i64: 256, 128>}, {transform_indices = @transform_2, window_bounds = array<i64: 1, 128>}, {transform_indices = @transform_3, window_bounds = array<i64: 64, 128>}]} {
    %c0 = arith.constant 0 : index
    %c0_0 = arith.constant 0 : index
    %0 = vector.load %arg2[%c0, %c0_0] : memref<64x256xbf16, #tpu.memory_space<vmem>>, vector<64x256xbf16>
    %c0_1 = arith.constant 0 : index
    %c0_2 = arith.constant 0 : index
    %1 = vector.load %arg3[%c0_1, %c0_2] : memref<256x128xbf16, #tpu.memory_space<vmem>>, vector<256x128xbf16>
    %cst = arith.constant dense<0.000000e+00> : vector<64x128xf32>
    %2 = tpu.matmul %0, %1, %cst {dimension_numbers = #tpu.dot_dimension_numbers<[1], [0], [0], [1], [0, 0, 1, 1], [], []>} : vector<64x256xbf16>, vector<256x128xbf16>, vector<64x128xf32> -> vector<64x128xf32>
    %c0_3 = arith.constant 0 : index
    %c0_4 = arith.constant 0 : index
    %3 = vector.load %arg4[%c0_3, %c0_4] : memref<1x128xf32, #tpu.memory_space<vmem>>, vector<1x128xf32>
    %4 = vector.broadcast %3 : vector<1x128xf32> to vector<64x128xf32>
    %5 = arith.addf %2, %4 : vector<64x128xf32>
    %cst_5 = arith.constant 0.000000e+00 : f32
    %6 = vector.broadcast %cst_5 : f32 to vector<64x128xf32>
    %7 = arith.maximumf %5, %6 : vector<64x128xf32>
    %c0_6 = arith.constant 0 : index
    %c0_7 = arith.constant 0 : index
    %8 = vector.load %arg5[%c0_6, %c0_7] : memref<64x128xf32, #tpu.memory_space<vmem>>, vector<64x128xf32>
    tpu.vector_store %arg5[%c0_6, %c0_7], %7 {strides = array<i32>} : memref<64x128xf32, #tpu.memory_space<vmem>>, vector<64x128xf32>,
    return
  }
  func.func @transform_0(%arg0: i32, %arg1: i32) -> (i32, i32) {
    %c0_i32 = arith.constant 0 : i32
    %c0_i32_0 = arith.constant 0 : i32
    return %arg0, %c0_i32 : i32, i32
  }
  func.func @transform_1(%arg0: i32, %arg1: i32) -> (i32, i32) {
    %c0_i32 = arith.constant 0 : i32
    %c0_i32_0 = arith.constant 0 : i32
    return %c0_i32, %arg1 : i32, i32
  }
  func.func @transform_2(%arg0: i32, %arg1: i32) -> (i32, i32) {
    %c0_i32 = arith.constant 0 : i32
    %c0_i32_0 = arith.constant 0 : i32
    return %c0_i32, %arg1 : i32, i32
  }
  func.func @transform_3(%arg0: i32, %arg1: i32) -> (i32, i32) {
    %c0_i32 = arith.constant 0 : i32
    return %arg0, %arg1 : i32, i32
  }
}

module attributes {stable_mosaic.version = 11 : i64} {
  func.func @_maxpool3_kernel(%arg0: i32, %arg1: i32, %arg2: memref<3x128x128xf32, #tpu.memory_space<vmem>>, %arg3: memref<128x128xf32, #tpu.memory_space<vmem>>) attributes {dimension_semantics = [#tpu.dimension_semantics<parallel>, #tpu.dimension_semantics<parallel>], iteration_bounds = array<i64: 1, 1>, scalar_prefetch = 0 : i64, scratch_operands = 0 : i64, tpu.core_type = #tpu.core_type<tc>, window_params = [{transform_indices = @transform_0, window_bounds = array<i64: 3, 128, 128>}, {transform_indices = @transform_1, window_bounds = array<i64: 128, 128>}]} {
    %c0 = arith.constant 0 : index
    %c0_0 = arith.constant 0 : index
    %c0_1 = arith.constant 0 : index
    %0 = vector.load %arg2[%c0, %c0_0, %c0_1] : memref<3x128x128xf32, #tpu.memory_space<vmem>>, vector<1x128x128xf32>
    %1 = vector.shape_cast %0 : vector<1x128x128xf32> to vector<128x128xf32>
    %c1 = arith.constant 1 : index
    %c0_2 = arith.constant 0 : index
    %c0_3 = arith.constant 0 : index
    %2 = vector.load %arg2[%c1, %c0_2, %c0_3] : memref<3x128x128xf32, #tpu.memory_space<vmem>>, vector<1x128x128xf32>
    %3 = vector.shape_cast %2 : vector<1x128x128xf32> to vector<128x128xf32>
    %4 = arith.maximumf %1, %3 : vector<128x128xf32>
    %c2 = arith.constant 2 : index
    %c0_4 = arith.constant 0 : index
    %c0_5 = arith.constant 0 : index
    %5 = vector.load %arg2[%c2, %c0_4, %c0_5] : memref<3x128x128xf32, #tpu.memory_space<vmem>>, vector<1x128x128xf32>
    %6 = vector.shape_cast %5 : vector<1x128x128xf32> to vector<128x128xf32>
    %7 = arith.maximumf %4, %6 : vector<128x128xf32>
    %c0_6 = arith.constant 0 : index
    %c0_7 = arith.constant 0 : index
    %8 = vector.load %arg3[%c0_6, %c0_7] : memref<128x128xf32, #tpu.memory_space<vmem>>, vector<128x128xf32>
    tpu.vector_store %arg3[%c0_6, %c0_7], %7 {strides = array<i32>} : memref<128x128xf32, #tpu.memory_space<vmem>>, vector<128x128xf32>,
    return
  }
  func.func @transform_0(%arg0: i32, %arg1: i32) -> (i32, i32, i32) {
    %c0_i32 = arith.constant 0 : i32
    %c0_i32_0 = arith.constant 0 : i32
    return %c0_i32, %arg0, %arg1 : i32, i32, i32
  }
  func.func @transform_1(%arg0: i32, %arg1: i32) -> (i32, i32) {
    %c0_i32 = arith.constant 0 : i32
    return %arg0, %arg1 : i32, i32
  }
}

</mosaic_0001>

<bundles_post_ra>
// kernel: inception_d_forward.9
= control target key start
LH: loop header
LB: loop body
LE: loop exit
PB: predicated region body
PF: predicated region fallthrough
CT: control target
= control target key end

     0   :  { %s1257_s12 = smov 0   ;;  %s1259_s13 = smov 0   ;;  %s1394_s0 = inlined_call_operand.vmem [shape: bf16[512,128], index: 0, kind: input, shape index: {}]   ;;  %s1395_s1 = inlined_call_operand.vmem [shape: bf16[128,128], index: 1, kind: input, shape index: {}]   ;;  %s1396_s2 = inlined_call_operand.vmem [shape: f32[1,128], index: 2, kind: input, shape index: {}]   ;;  %s1397_s3 = inlined_call_operand.vmem [shape: bf16[512,128], index: 3, kind: output, shape index: {}]  }
   0x1   :  { %s1261_s14 = smov 0  }
   0x2 LB: > { %s25_s15 = sadd.s32 1, %s1231_s13  ;;  %p886_p0 = scmp.ge.s32.totalorder %s1235_s14, 1  ;;  %s1235_s14 = sphi %s1261_s14, %s13_s14   ;;  %s1231_s13 = sphi %s1259_s13, %s1399_s13   ;;  %s1227_s12 = sphi %s1257_s12, %s1398_s12  }
   0x3   : > { %p27_p1 = scmp.ge.s32.totalorder %s25_s15, 2  ;;  %p169_p2 = scmp.lt.s32.totalorder %s1235_s14, 3 }
   0x5   : > { %s1401_s15 = smov (%p27_p1, %s25_s15), 0  ;;  %p170_p3 = pnand %p886_p0, %p169_p2 }
   0x6   : > { %v1189_v0 = vld [vmem:[%s1395_s1] sm:$0xff] (!%p170_p3)   ;;  %s887_s18 = sshll.u32 (!%p170_p3), %s1227_s12, 5  ;;  %v1190_v1 = vld [vmem:[%s1395_s1 + $0x8] sm:$0xff] (!%p170_p3)   ;;  %v1191_v2 = vld [vmem:[%s1395_s1 + $0x10] sm:$0xff] (!%p170_p3)  }
   0x7   : > { %173 = sbr.rel (%p170_p3) target bundleno = 285 (0x11d), region = 32  ;;  %p204_p4 = scmp.lt.s32.totalorder (!%p170_p3), %s887_s18, 63  ;;  %1101 = vmatprep.subr.bf16.mxu0 (!%p170_p3), %v1189_v0  ;;  %1149 = vmatprep.subr.bf16.mxu1 (!%p170_p3), %v1189_v0  ;;  %v1192_v3 = vld [vmem:[%s1395_s1 + $0x18] sm:$0xff] (!%p170_p3)   ;;  %v1193_v6 = vld [vmem:[%s1395_s1 + $0x20] sm:$0xff] (!%p170_p3)   ;;  %v1194_v7 = vld [vmem:[%s1395_s1 + $0x28] sm:$0xff] (!%p170_p3)  }
   0x8   : > { %1102 = vmatpush3.bf16.msra.mxu0 (!%p170_p3), %v1189_v0  ;;  %1157 = vmatpush3.bf16.msra.mxu1 (!%p170_p3), %v1189_v0  ;;  %v1195_v8 = vld [vmem:[%s1395_s1 + $0x30] sm:$0xff] (!%p170_p3)   ;;  %v1196_v9 = vld [vmem:[%s1395_s1 + $0x38] sm:$0xff] (!%p170_p3)   ;;  %v1328_v24 = vld [vmem:[%s1396_s2] ss:$0 sm:$0xff] (!%p170_p3) }
   0x9   : > { %1103 = vmatprep.subr.bf16.mxu0 (!%p170_p3), %v1190_v1  ;;  %1150 = vmatprep.subr.bf16.mxu1 (!%p170_p3), %v1190_v1 }
   0xc   : > { %1104 = vmatpush3.bf16.msra.mxu0 (!%p170_p3), %v1190_v1  ;;  %1158 = vmatpush3.bf16.msra.mxu1 (!%p170_p3), %v1190_v1 }
   0xd   : > { %1105 = vmatprep.subr.bf16.mxu0 (!%p170_p3), %v1191_v2  ;;  %1151 = vmatprep.subr.bf16.mxu1 (!%p170_p3), %v1191_v2 }
   0xe   : > { %s1403_s18 = smov (!%p204_p4, %s887_s18), 63 }
   0xf   : > { %s888_s23 = sshll.u32 %s1403_s18, 2 }
  0x10   : > { %s1292_s26 = scalar_lea.vmem %s1394_s0, %s888_s23  ;;  %1106 = vmatpush3.bf16.msra.mxu0 %v1191_v2  ;;  %1159 = vmatpush3.bf16.msra.mxu1 %v1191_v2  ;;  %s1343_s17 = scalar_lea.vmem %s1397_s3, %s888_s23 }
  0x11   : > { %v1197_v4 = vld [vmem:[%s1292_s26] sm:$0xff]   ;;  %1107 = vmatprep.subr.bf16.mxu0 %v1192_v3  ;;  %1152 = vmatprep.subr.bf16.mxu1 %v1192_v3  ;;  %v1199_v10 = vld [vmem:[%s1292_s26 + $0x8] sm:$0xff]   ;;  %v1201_v12 = vld [vmem:[%s1292_s26 + $0x10] sm:$0xff]  }
  0x12   : > { %v1198_v5 = vld [vmem:[%s1292_s26 + $0x40] sm:$0xff]   ;;  %1117 = vmatprep.mubr.bf16.mxu0 %v1197_v4  ;;  %v1200_v11 = vld [vmem:[%s1292_s26 + $0x48] sm:$0xff]   ;;  %v1202_v13 = vld [vmem:[%s1292_s26 + $0x50] sm:$0xff]  }
  0x13   : > { %1133 = vmatprep.mubr.bf16.mxu1 %v1198_v5  ;;  %v1203_v14 = vld [vmem:[%s1292_s26 + $0x18] sm:$0xff]   ;;  %v1205_v16 = vld [vmem:[%s1292_s26 + $0x20] sm:$0xff]   ;;  %v1207_v18 = vld [vmem:[%s1292_s26 + $0x28] sm:$0xff]  }
  0x14   : > { %1108 = vmatpush3.bf16.msra.mxu0 %v1192_v3  ;;  %1160 = vmatpush3.bf16.msra.mxu1 %v1192_v3  ;;  %v1204_v15 = vld [vmem:[%s1292_s26 + $0x58] sm:$0xff]   ;;  %v1206_v17 = vld [vmem:[%s1292_s26 + $0x60] sm:$0xff]   ;;  %v1208_v19 = vld [vmem:[%s1292_s26 + $0x68] sm:$0xff]  }
  0x15   : > { %1109 = vmatprep.subr.bf16.mxu0 %v1193_v6  ;;  %1153 = vmatprep.subr.bf16.mxu1 %v1193_v6  ;;  %v1209_v20 = vld [vmem:[%s1292_s26 + $0x30] sm:$0xff]   ;;  %v1211_v22 = vld [vmem:[%s1292_s26 + $0x38] sm:$0xff]  }
  0x16   : > { %v1210_v21 = vld [vmem:[%s1292_s26 + $0x70] sm:$0xff]   ;;  %v1212_v23 = vld [vmem:[%s1292_s26 + $0x78] sm:$0xff]  }
  0x18   : > { %1110 = vmatpush3.bf16.msra.mxu0 %v1193_v6  ;;  %1161 = vmatpush3.bf16.msra.mxu1 %v1193_v6 }
  0x19   : > { %1111 = vmatprep.subr.bf16.mxu0 %v1194_v7  ;;  %1154 = vmatprep.subr.bf16.mxu1 %v1194_v7 }
  0x1c   : > { %1112 = vmatpush3.bf16.msra.mxu0 %v1194_v7  ;;  %1162 = vmatpush3.bf16.msra.mxu1 %v1194_v7 }
  0x1d   : > { %1113 = vmatprep.subr.bf16.mxu0 %v1195_v8  ;;  %1155 = vmatprep.subr.bf16.mxu1 %v1195_v8 }
  0x20   : > { %1114 = vmatpush3.bf16.msra.mxu0 %v1195_v8  ;;  %1163 = vmatpush3.bf16.msra.mxu1 %v1195_v8 }
  0x21   : > { %1115 = vmatprep.subr.bf16.mxu0 %v1196_v9  ;;  %1156 = vmatprep.subr.bf16.mxu1 %v1196_v9 }
  0x24   : > { %1116 = vmatpush3.bf16.msra.mxu0 %v1196_v9  ;;  %1164 = vmatpush3.bf16.msra.mxu1 %v1196_v9 }
  0x27   : > { %1118 = vmatmul.mubr.bf16.vlgmr.msra.gmra.mrb[0].mxu0 %v1199_v10  ;;  %1134 = vmatmul.mubr.bf16.vlgmr.msra.gmra.mrb[0].mxu1 %v1200_v11 }
  0x28   : > { %1121 = vmatprep.mubr.bf16.mxu0 %v1201_v12  ;;  %1137 = vmatprep.mubr.bf16.mxu1 %v1202_v13 }
  0x2f   : > { %1122 = vmatmul.mubr.bf16.gmra.mrb[4].mxu0 %v1203_v14  ;;  %1138 = vmatmul.mubr.bf16.gmra.mrb[4].mxu1 %v1204_v15 }
  0x30   : > { %1125 = vmatprep.mubr.bf16.mxu0 %v1205_v16  ;;  %1141 = vmatprep.mubr.bf16.mxu1 %v1206_v17 }
  0x37   : > { %1126 = vmatmul.mubr.bf16.gmra.mrb[8].mxu0 %v1207_v18  ;;  %1142 = vmatmul.mubr.bf16.gmra.mrb[8].mxu1 %v1208_v19 }
  0x38   : > { %1129 = vmatprep.mubr.bf16.mxu0 %v1209_v20  ;;  %1145 = vmatprep.mubr.bf16.mxu1 %v1210_v21 }
  0x3f   : > { %1130 = vmatmul.mubr.bf16.gmra.mrb[12].mxu0 %v1211_v22  ;;  %1146 = vmatmul.mubr.bf16.gmra.mrb[12].mxu1 %v1212_v23 }
  0xfa   : > { %v1119_v25 = vpop.f32.mrb[0].mxu0  ;;  %v1135_v26 = vpop.f32.mrb[0].mxu1 }
  0xfb   : > { %v468_v27 = vadd.f32 %v1119_v25, %v1328_v24  ;;  %v532_v28 = vadd.f32 %v1135_v26, %v1328_v24  ;;  %v459_v29 = vpop.f32.mrb[1].mxu0  ;;  %v523_v30 = vpop.f32.mrb[1].mxu1 }
  0xfc   : > { %v460_v31 = vadd.f32 %v1328_v24, %v459_v29  ;;  %v524_v32 = vadd.f32 %v1328_v24, %v523_v30  ;;  %v1120_v33 = vpop.f32.mrb[2].mxu0  ;;  %v1136_v34 = vpop.f32.mrb[2].mxu1 }
  0xfd   : > { %v471_v35 = vadd.f32 %v1120_v33, %v1328_v24  ;;  %v535_v36 = vadd.f32 %v1136_v34, %v1328_v24  ;;  %v462_v37 = vpop.f32.mrb[3].mxu0  ;;  %v526_v38 = vpop.f32.mrb[3].mxu1  ;;  %v588_v41 = vmax.f32 %v468_v27, 0.0  ;;  %v604_v42 = vmax.f32 %v532_v28, 0.0 }
  0xfe   : > { %v463_v39 = vadd.f32 %v1328_v24, %v462_v37  ;;  %v527_v40 = vadd.f32 %v1328_v24, %v526_v38  ;;  %v586_v45 = vmax.f32 %v460_v31, 0.0  ;;  %v602_v46 = vmax.f32 %v524_v32, 0.0 }
  0xff   : > { %v589_v43 = vmax.f32 %v471_v35, 0.0  ;;  %v605_v44 = vmax.f32 %v535_v36, 0.0 }
 0x100   : > { %v587_v47 = vmax.f32 %v463_v39, 0.0  ;;  %v603_v48 = vmax.f32 %v527_v40, 0.0 }
 0x101   : > { %v990_v49 = vpack.c.bf16 %v589_v43, %v588_v41  ;;  %v1030_v50 = vpack.c.bf16 %v605_v44, %v604_v42 }
 0x102   : > { %v985_v51 = vpack.c.bf16 %v587_v47, %v586_v45  ;;  %v1025_v52 = vpack.c.bf16 %v603_v48, %v602_v46  ;;  %v1123_v53 = vpop.f32.mrb[4].mxu0  ;;  %v1139_v54 = vpop.f32.mrb[4].mxu1 }
 0x103   : > { %1062 = vst [vmem:[%s1343_s17 + $0x8] sm:$0xff] %v990_v49   ;;  %1070 = vst [vmem:[%s1343_s17 + $0x48] sm:$0xff] %v1030_v50   ;;  %v484_v55 = vadd.f32 %v1123_v53, %v1328_v24  ;;  %v548_v56 = vadd.f32 %v1139_v54, %v1328_v24  ;;  %v475_v57 = vpop.f32.mrb[5].mxu0  ;;  %v539_v58 = vpop.f32.mrb[5].mxu1 }
 0x104   : > { %986 = vst [vmem:[%s1343_s17] sm:$0xff] %v985_v51   ;;  %1069 = vst [vmem:[%s1343_s17 + $0x40] sm:$0xff] %v1025_v52   ;;  %v476_v59 = vadd.f32 %v1328_v24, %v475_v57  ;;  %v540_v60 = vadd.f32 %v1328_v24, %v539_v58  ;;  %v1124_v61 = vpop.f32.mrb[6].mxu0  ;;  %v1140_v62 = vpop.f32.mrb[6].mxu1 }
 0x105   : > { %v487_v63 = vadd.f32 %v1124_v61, %v1328_v24  ;;  %v551_v0 = vadd.f32 %v1140_v62, %v1328_v24  ;;  %v478_v1 = vpop.f32.mrb[7].mxu0  ;;  %v542_v2 = vpop.f32.mrb[7].mxu1  ;;  %v592_v5 = vmax.f32 %v484_v55, 0.0  ;;  %v608_v6 = vmax.f32 %v548_v56, 0.0 }
 0x106   : > { %v479_v3 = vadd.f32 %v1328_v24, %v478_v1  ;;  %v543_v4 = vadd.f32 %v1328_v24, %v542_v2  ;;  %v590_v9 = vmax.f32 %v476_v59, 0.0  ;;  %v606_v10 = vmax.f32 %v540_v60, 0.0 }
 0x107   : > { %v593_v7 = vmax.f32 %v487_v63, 0.0  ;;  %v609_v8 = vmax.f32 %v551_v0, 0.0 }
 0x108   : > { %v591_v11 = vmax.f32 %v479_v3, 0.0  ;;  %v607_v12 = vmax.f32 %v543_v4, 0.0 }
 0x109   : > { %v1000_v13 = vpack.c.bf16 %v593_v7, %v592_v5  ;;  %v1040_v14 = vpack.c.bf16 %v609_v8, %v608_v6 }
 0x10a   : > { %v995_v15 = vpack.c.bf16 %v591_v11, %v590_v9  ;;  %v1035_v16 = vpack.c.bf16 %v607_v12, %v606_v10  ;;  %v1127_v17 = vpop.f32.mrb[8].mxu0  ;;  %v1143_v18 = vpop.f32.mrb[8].mxu1 }
 0x10b   : > { %1064 = vst [vmem:[%s1343_s17 + $0x18] sm:$0xff] %v1000_v13   ;;  %1072 = vst [vmem:[%s1343_s17 + $0x58] sm:$0xff] %v1040_v14   ;;  %v500_v19 = vadd.f32 %v1127_v17, %v1328_v24  ;;  %v564_v20 = vadd.f32 %v1143_v18, %v1328_v24  ;;  %v491_v21 = vpop.f32.mrb[9].mxu0  ;;  %v555_v22 = vpop.f32.mrb[9].mxu1 }
 0x10c   : > { %1063 = vst [vmem:[%s1343_s17 + $0x10] sm:$0xff] %v995_v15   ;;  %1071 = vst [vmem:[%s1343_s17 + $0x50] sm:$0xff] %v1035_v16   ;;  %v492_v23 = vadd.f32 %v1328_v24, %v491_v21  ;;  %v556_v25 = vadd.f32 %v1328_v24, %v555_v22  ;;  %v1128_v26 = vpop.f32.mrb[10].mxu0  ;;  %v1144_v27 = vpop.f32.mrb[10].mxu1 }
 0x10d   : > { %v503_v28 = vadd.f32 %v1128_v26, %v1328_v24  ;;  %v567_v29 = vadd.f32 %v1144_v27, %v1328_v24  ;;  %v494_v30 = vpop.f32.mrb[11].mxu0  ;;  %v558_v31 = vpop.f32.mrb[11].mxu1  ;;  %v596_v34 = vmax.f32 %v500_v19, 0.0  ;;  %v612_v35 = vmax.f32 %v564_v20, 0.0 }
 0x10e   : > { %v495_v32 = vadd.f32 %v1328_v24, %v494_v30  ;;  %v559_v33 = vadd.f32 %v1328_v24, %v558_v31  ;;  %v594_v38 = vmax.f32 %v492_v23, 0.0  ;;  %v610_v39 = vmax.f32 %v556_v25, 0.0 }
 0x10f   : > { %v597_v36 = vmax.f32 %v503_v28, 0.0  ;;  %v613_v37 = vmax.f32 %v567_v29, 0.0 }
 0x110   : > { %v595_v40 = vmax.f32 %v495_v32, 0.0  ;;  %v611_v41 = vmax.f32 %v559_v33, 0.0 }
 0x111   : > { %v1010_v42 = vpack.c.bf16 %v597_v36, %v596_v34  ;;  %v1050_v43 = vpack.c.bf16 %v613_v37, %v612_v35 }
 0x112   : > { %v1005_v44 = vpack.c.bf16 %v595_v40, %v594_v38  ;;  %v1045_v45 = vpack.c.bf16 %v611_v41, %v610_v39  ;;  %v1131_v46 = vpop.f32.mrb[12].mxu0  ;;  %v1147_v47 = vpop.f32.mrb[12].mxu1 }
 0x113   : > { %1066 = vst [vmem:[%s1343_s17 + $0x28] sm:$0xff] %v1010_v42   ;;  %1074 = vst [vmem:[%s1343_s17 + $0x68] sm:$0xff] %v1050_v43   ;;  %v516_v48 = vadd.f32 %v1131_v46, %v1328_v24  ;;  %v580_v49 = vadd.f32 %v1147_v47, %v1328_v24  ;;  %v507_v50 = vpop.f32.mrb[13].mxu0  ;;  %v571_v51 = vpop.f32.mrb[13].mxu1 }
 0x114   : > { %1065 = vst [vmem:[%s1343_s17 + $0x20] sm:$0xff] %v1005_v44   ;;  %1073 = vst [vmem:[%s1343_s17 + $0x60] sm:$0xff] %v1045_v45   ;;  %v508_v52 = vadd.f32 %v1328_v24, %v507_v50  ;;  %v572_v53 = vadd.f32 %v1328_v24, %v571_v51  ;;  %v1132_v54 = vpop.f32.mrb[14].mxu0  ;;  %v1148_v55 = vpop.f32.mrb[14].mxu1 }
 0x115   : > { %v519_v56 = vadd.f32 %v1132_v54, %v1328_v24  ;;  %v583_v57 = vadd.f32 %v1148_v55, %v1328_v24  ;;  %v510_v58 = vpop.f32.mrb[15].mxu0  ;;  %v574_v59 = vpop.f32.mrb[15].mxu1  ;;  %v600_v62 = vmax.f32 %v516_v48, 0.0  ;;  %v616_v63 = vmax.f32 %v580_v49, 0.0 }
 0x116   : > { %v511_v60 = vadd.f32 %v1328_v24, %v510_v58  ;;  %v575_v61 = vadd.f32 %v1328_v24, %v574_v59  ;;  %v598_v2 = vmax.f32 %v508_v52, 0.0  ;;  %v614_v3 = vmax.f32 %v572_v53, 0.0 }
 0x117   : > { %v601_v0 = vmax.f32 %v519_v56, 0.0  ;;  %v617_v1 = vmax.f32 %v583_v57, 0.0 }
 0x118   : > { %v599_v4 = vmax.f32 %v511_v60, 0.0  ;;  %v615_v5 = vmax.f32 %v575_v61, 0.0 }
 0x119   : > { %v1020_v6 = vpack.c.bf16 %v601_v0, %v600_v62  ;;  %v1060_v7 = vpack.c.bf16 %v617_v1, %v616_v63 }
 0x11a   : > { %v1015_v8 = vpack.c.bf16 %v599_v4, %v598_v2  ;;  %v1055_v9 = vpack.c.bf16 %v615_v5, %v614_v3 }
 0x11b   : > { %1068 = vst [vmem:[%s1343_s17 + $0x38] sm:$0xff] %v1020_v6   ;;  %1076 = vst [vmem:[%s1343_s17 + $0x78] sm:$0xff] %v1060_v7  }
 0x11c   : > { %1067 = vst [vmem:[%s1343_s17 + $0x30] sm:$0xff] %v1015_v8   ;;  %1075 = vst [vmem:[%s1343_s17 + $0x70] sm:$0xff] %v1055_v9  }
 0x11d PF: > { %s13_s14 = sadd.s32 1, %s1235_s14   ;;  %s1398_s12 = smov %s1231_s13 }
 0x11e   : > { %p10_p5 = scmp.ge.s32.totalorder %s13_s14, 4   ;;  %s1399_s13 = smov %s1401_s15 }
 0x120   :  { %12 = sbr.rel (!%p10_p5) target bundleno = 2 (0x2), region = 68 }

// kernel: inception_d_forward.12
= control target key start
LH: loop header
LB: loop body
LE: loop exit
PB: predicated region body
PF: predicated region fallthrough
CT: control target
= control target key end

     0   :  { %s787_s12 = smov 0   ;;  %s789_s13 = smov 0   ;;  %s898_s0 = inlined_call_operand.vmem [shape: bf16[128,256], index: 0, kind: input, shape index: {}]   ;;  %s899_s1 = inlined_call_operand.vmem [shape: bf16[256,128], index: 1, kind: input, shape index: {}]   ;;  %s900_s2 = inlined_call_operand.vmem [shape: f32[1,128], index: 2, kind: input, shape index: {}]   ;;  %s901_s3 = inlined_call_operand.vmem [shape: f32[128,128], index: 3, kind: output, shape index: {}]  }
   0x1   :  { %s791_s14 = smov 0  }
   0x2 LB: > { %s25_s15 = sadd.s32 1, %s761_s13  ;;  %p601_p0 = scmp.ge.s32.totalorder %s765_s14, 1  ;;  %s765_s14 = sphi %s791_s14, %s13_s14   ;;  %s761_s13 = sphi %s789_s13, %s903_s13   ;;  %s757_s12 = sphi %s787_s12, %s902_s12  }
   0x3   : > { %p27_p1 = scmp.ge.s32.totalorder %s25_s15, 2  ;;  %p170_p2 = scmp.lt.s32.totalorder %s765_s14, 3 }
   0x5   : > { %s905_s15 = smov (%p27_p1, %s25_s15), 0  ;;  %p171_p3 = pnand %p601_p0, %p170_p2 }
   0x6   : > { %v715_v0 = vld [vmem:[%s899_s1 + $0x40] sm:$0xff] (!%p171_p3)   ;;  %s602_s18 = sshll.u32 (!%p171_p3), %s757_s12, 3  ;;  %v717_v2 = vld [vmem:[%s899_s1 + $0x48] sm:$0xff] (!%p171_p3)   ;;  %v719_v4 = vld [vmem:[%s899_s1 + $0x50] sm:$0xff] (!%p171_p3)  }
   0x7   : > { %174 = sbr.rel (%p171_p3) target bundleno = 269 (0x10d), region = 32  ;;  %v716_v1 = vld [vmem:[%s899_s1] sm:$0xff] (!%p171_p3)   ;;  %635 = vmatprep.subr.bf16.mxu0 (!%p171_p3), %v715_v0  ;;  %675 = vmatprep.subr.bf16.mxu1 (!%p171_p3), %v715_v0  ;;  %v718_v3 = vld [vmem:[%s899_s1 + $0x8] sm:$0xff] (!%p171_p3)   ;;  %p206_p4 = scmp.lt.s32.totalorder (!%p171_p3), %s602_s18, 15  ;;  %v720_v5 = vld [vmem:[%s899_s1 + $0x10] sm:$0xff] (!%p171_p3)  }
   0x8   : > { %636 = vmatpush3.bf16.msra.mxu0 (!%p171_p3), %v716_v1  ;;  %683 = vmatpush3.bf16.msra.mxu1 (!%p171_p3), %v716_v1  ;;  %v721_v6 = vld [vmem:[%s899_s1 + $0x58] sm:$0xff] (!%p171_p3)   ;;  %v723_v8 = vld [vmem:[%s899_s1 + $0x60] sm:$0xff] (!%p171_p3)   ;;  %v725_v10 = vld [vmem:[%s899_s1 + $0x68] sm:$0xff] (!%p171_p3)  }
   0x9   : > { %637 = vmatprep.subr.bf16.mxu0 (!%p171_p3), %v717_v2  ;;  %676 = vmatprep.subr.bf16.mxu1 (!%p171_p3), %v717_v2  ;;  %v722_v7 = vld [vmem:[%s899_s1 + $0x18] sm:$0xff] (!%p171_p3)   ;;  %v724_v9 = vld [vmem:[%s899_s1 + $0x20] sm:$0xff] (!%p171_p3)   ;;  %v726_v13 = vld [vmem:[%s899_s1 + $0x28] sm:$0xff] (!%p171_p3)  }
   0xa   : > { %v727_v14 = vld [vmem:[%s899_s1 + $0x70] sm:$0xff] (!%p171_p3)   ;;  %v729_v16 = vld [vmem:[%s899_s1 + $0x78] sm:$0xff] (!%p171_p3)   ;;  %v607_v26 = vld [vmem:[%s900_s2] ss:$0 sm:$0xff] (!%p171_p3) }
   0xb   : > { %v728_v15 = vld [vmem:[%s899_s1 + $0x30] sm:$0xff] (!%p171_p3)   ;;  %v730_v17 = vld [vmem:[%s899_s1 + $0x38] sm:$0xff] (!%p171_p3)  }
   0xc   : > { %638 = vmatpush3.bf16.msra.mxu0 (!%p171_p3), %v718_v3  ;;  %684 = vmatpush3.bf16.msra.mxu1 (!%p171_p3), %v718_v3 }
   0xd   : > { %639 = vmatprep.subr.bf16.mxu0 (!%p171_p3), %v719_v4  ;;  %677 = vmatprep.subr.bf16.mxu1 (!%p171_p3), %v719_v4 }
   0xe   : > { %s907_s18 = smov (!%p206_p4, %s602_s18), 15 }
   0xf   : > { %s634_s6 = sshll.u32 %s907_s18, 3 }
  0x10   : > { %640 = vmatpush3.bf16.msra.mxu0 %v720_v5  ;;  %685 = vmatpush3.bf16.msra.mxu1 %v720_v5  ;;  %s840_s11 = scalar_lea.vmem %s898_s0, %s634_s6  ;;  %s879_s8 = scalar_lea.vmem %s901_s3, %s634_s6 }
  0x11   : > { %641 = vmatprep.subr.bf16.mxu0 %v721_v6  ;;  %678 = vmatprep.subr.bf16.mxu1 %v721_v6  ;;  %v733_v11 = vld [vmem:[%s840_s11 + $0x4] ss:$8 sps:$4 sm:$0xff]   ;;  %v731_v18 = vld [vmem:[%s840_s11] ss:$8 sps:$4 sm:$0xff]   ;;  %v737_v20 = vld [vmem:[%s840_s11 + $0x14] ss:$8 sps:$4 sm:$0xff]  }
  0x12   : > { %v736_v12 = vld [vmem:[%s840_s11 + $0x24] ss:$8 sps:$4 sm:$0xff]   ;;  %444 = vmatprep.mubr.bf16.mxu0 %v733_v11  ;;  %v734_v19 = vld [vmem:[%s840_s11 + $0x20] ss:$8 sps:$4 sm:$0xff]   ;;  %v739_v21 = vld [vmem:[%s840_s11 + $0x34] ss:$8 sps:$4 sm:$0xff]  }
  0x13   : > { %460 = vmatprep.mubr.bf16.mxu1 %v736_v12  ;;  %v741_v22 = vld [vmem:[%s840_s11 + $0x10] ss:$8 sps:$4 sm:$0xff]  }
  0x14   : > { %642 = vmatpush3.bf16.msra.mxu0 %v722_v7  ;;  %686 = vmatpush3.bf16.msra.mxu1 %v722_v7  ;;  %v742_v23 = vld [vmem:[%s840_s11 + $0x30] ss:$8 sps:$4 sm:$0xff]  }
  0x15   : > { %643 = vmatprep.subr.bf16.mxu0 %v723_v8  ;;  %679 = vmatprep.subr.bf16.mxu1 %v723_v8 }
  0x18   : > { %644 = vmatpush3.bf16.msra.mxu0 %v724_v9  ;;  %687 = vmatpush3.bf16.msra.mxu1 %v724_v9 }
  0x19   : > { %645 = vmatprep.subr.bf16.mxu0 %v725_v10  ;;  %680 = vmatprep.subr.bf16.mxu1 %v725_v10 }
  0x1c   : > { %646 = vmatpush3.bf16.msra.mxu0 %v726_v13  ;;  %688 = vmatpush3.bf16.msra.mxu1 %v726_v13 }
  0x1d   : > { %647 = vmatprep.subr.bf16.mxu0 %v727_v14  ;;  %681 = vmatprep.subr.bf16.mxu1 %v727_v14 }
  0x20   : > { %648 = vmatpush3.bf16.msra.mxu0 %v728_v15  ;;  %689 = vmatpush3.bf16.msra.mxu1 %v728_v15 }
  0x21   : > { %649 = vmatprep.subr.bf16.mxu0 %v729_v16  ;;  %682 = vmatprep.subr.bf16.mxu1 %v729_v16 }
  0x24   : > { %650 = vmatpush3.bf16.msra.mxu0 %v730_v17  ;;  %690 = vmatpush3.bf16.msra.mxu1 %v730_v17 }
  0x27   : > { %445 = vmatmul.mubr.bf16.vlgmr.msra.gmra.mrb[0].mxu0 %v731_v18  ;;  %461 = vmatmul.mubr.bf16.vlgmr.msra.gmra.mrb[0].mxu1 %v734_v19 }
  0x28   : > { %452 = vmatprep.mubr.bf16.mxu0 %v737_v20  ;;  %468 = vmatprep.mubr.bf16.mxu1 %v739_v21 }
  0x2f   : > { %453 = vmatmul.mubr.bf16.gmra.mrb[4].mxu0 %v741_v22  ;;  %469 = vmatmul.mubr.bf16.gmra.mrb[4].mxu1 %v742_v23 }
  0xfa   : > { %v651_v24 = vpop.f32.mrb[0].mxu0  ;;  %v663_v25 = vpop.f32.mrb[0].mxu1 }
  0xfb   : > { %v652_v27 = vpop.f32.mrb[1].mxu0  ;;  %v664_v28 = vpop.f32.mrb[1].mxu1 }
  0xfc   : > { %v653_v29 = vadd.f32 %v652_v27, %v651_v24  ;;  %v665_v30 = vadd.f32 %v664_v28, %v663_v25  ;;  %v654_v31 = vpop.f32.mrb[2].mxu0  ;;  %v666_v32 = vpop.f32.mrb[2].mxu1 }
  0xfd   : > { %v655_v33 = vpop.f32.mrb[3].mxu0  ;;  %v667_v34 = vpop.f32.mrb[3].mxu1 }
  0xfe   : > { %v447_v35 = vadd.f32 %v653_v29, %v607_v26  ;;  %v463_v36 = vadd.f32 %v665_v30, %v607_v26  ;;  %v656_v37 = vadd.f32 %v655_v33, %v654_v31  ;;  %v668_v38 = vadd.f32 %v667_v34, %v666_v32 }
 0x100   : > { %v477_v39 = vmax.f32 %v447_v35, 0.0  ;;  %v481_v40 = vmax.f32 %v463_v36, 0.0  ;;  %v450_v41 = vadd.f32 %v656_v37, %v607_v26  ;;  %v466_v42 = vadd.f32 %v668_v38, %v607_v26 }
 0x102   : > { %485 = vst [vmem:[%s879_s8] sm:$0xff] %v477_v39  ;;  %489 = vst [vmem:[%s879_s8 + $0x20] sm:$0xff] %v481_v40  ;;  %v478_v43 = vmax.f32 %v450_v41, 0.0  ;;  %v482_v44 = vmax.f32 %v466_v42, 0.0  ;;  %v657_v45 = vpop.f32.mrb[4].mxu0  ;;  %v669_v46 = vpop.f32.mrb[4].mxu1 }
 0x103   : > { %v658_v47 = vpop.f32.mrb[5].mxu0  ;;  %v670_v48 = vpop.f32.mrb[5].mxu1 }
 0x104   : > { %486 = vst [vmem:[%s879_s8 + $0x8] sm:$0xff] %v478_v43  ;;  %490 = vst [vmem:[%s879_s8 + $0x28] sm:$0xff] %v482_v44  ;;  %v659_v49 = vadd.f32 %v658_v47, %v657_v45  ;;  %v671_v50 = vadd.f32 %v670_v48, %v669_v46  ;;  %v660_v51 = vpop.f32.mrb[6].mxu0  ;;  %v672_v52 = vpop.f32.mrb[6].mxu1 }
 0x105   : > { %v661_v53 = vpop.f32.mrb[7].mxu0  ;;  %v673_v54 = vpop.f32.mrb[7].mxu1 }
 0x106   : > { %v455_v55 = vadd.f32 %v659_v49, %v607_v26  ;;  %v471_v56 = vadd.f32 %v671_v50, %v607_v26  ;;  %v662_v57 = vadd.f32 %v661_v53, %v660_v51  ;;  %v674_v58 = vadd.f32 %v673_v54, %v672_v52 }
 0x108   : > { %v479_v59 = vmax.f32 %v455_v55, 0.0  ;;  %v483_v60 = vmax.f32 %v471_v56, 0.0  ;;  %v458_v61 = vadd.f32 %v662_v57, %v607_v26  ;;  %v474_v62 = vadd.f32 %v674_v58, %v607_v26 }
 0x10a   : > { %487 = vst [vmem:[%s879_s8 + $0x10] sm:$0xff] %v479_v59  ;;  %491 = vst [vmem:[%s879_s8 + $0x30] sm:$0xff] %v483_v60  ;;  %v480_v63 = vmax.f32 %v458_v61, 0.0  ;;  %v484_v0 = vmax.f32 %v474_v62, 0.0 }
 0x10c   : > { %488 = vst [vmem:[%s879_s8 + $0x18] sm:$0xff] %v480_v63  ;;  %492 = vst [vmem:[%s879_s8 + $0x38] sm:$0xff] %v484_v0 }
 0x10d PF: > { %s13_s14 = sadd.s32 1, %s765_s14   ;;  %s902_s12 = smov %s761_s13 }
 0x10e   : > { %p10_p5 = scmp.ge.s32.totalorder %s13_s14, 4   ;;  %s903_s13 = smov %s905_s15 }
 0x110   :  { %12 = sbr.rel (!%p10_p5) target bundleno = 2 (0x2), region = 68 }

// kernel: inception_d_forward.13
= control target key start
LH: loop header
LB: loop body
LE: loop exit
PB: predicated region body
PF: predicated region fallthrough
CT: control target
= control target key end

     0   :  { %s344_s0 = inlined_call_operand.vmem [shape: f32[3,128,128], index: 0, kind: input, shape index: {}]   ;;  %s345_s1 = inlined_call_operand.vmem [shape: f32[128,128], index: 1, kind: output, shape index: {}]  }
   0x1   :  { %v8_v0 = vld [vmem:[%s344_s0] sm:$0xff]  ;;  %v9_v4 = vld [vmem:[%s344_s0 + $0x8] sm:$0xff]  ;;  %v10_v8 = vld [vmem:[%s344_s0 + $0x10] sm:$0xff] }
   0x2   :  { %v110_v1 = vld [vmem:[%s344_s0 + $0x80] sm:$0xff]  ;;  %v111_v5 = vld [vmem:[%s344_s0 + $0x88] sm:$0xff]  ;;  %v112_v9 = vld [vmem:[%s344_s0 + $0x90] sm:$0xff] }
   0x3   :  { %v126_v2 = vld [vmem:[%s344_s0 + $0x100] sm:$0xff]  ;;  %v41_v3 = vmax.f32 %v8_v0, %v110_v1  ;;  %v127_v6 = vld [vmem:[%s344_s0 + $0x108] sm:$0xff]  ;;  %v42_v7 = vmax.f32 %v9_v4, %v111_v5  ;;  %v128_v10 = vld [vmem:[%s344_s0 + $0x110] sm:$0xff]  ;;  %v43_v12 = vmax.f32 %v10_v8, %v112_v9 }
   0x4   :  { %v11_v13 = vld [vmem:[%s344_s0 + $0x18] sm:$0xff]  ;;  %v12_v18 = vld [vmem:[%s344_s0 + $0x20] sm:$0xff]  ;;  %v13_v23 = vld [vmem:[%s344_s0 + $0x28] sm:$0xff] }
   0x5   :  { %v74_v11 = vmax.f32 %v41_v3, %v126_v2  ;;  %v113_v14 = vld [vmem:[%s344_s0 + $0x98] sm:$0xff]  ;;  %v75_v16 = vmax.f32 %v42_v7, %v127_v6  ;;  %v114_v19 = vld [vmem:[%s344_s0 + $0xa0] sm:$0xff]  ;;  %v76_v21 = vmax.f32 %v43_v12, %v128_v10  ;;  %v115_v24 = vld [vmem:[%s344_s0 + $0xa8] sm:$0xff] }
   0x6   :  { %v129_v15 = vld [vmem:[%s344_s0 + $0x118] sm:$0xff]  ;;  %v44_v17 = vmax.f32 %v11_v13, %v113_v14  ;;  %v130_v20 = vld [vmem:[%s344_s0 + $0x120] sm:$0xff]  ;;  %v45_v22 = vmax.f32 %v12_v18, %v114_v19  ;;  %v131_v25 = vld [vmem:[%s344_s0 + $0x128] sm:$0xff]  ;;  %v46_v27 = vmax.f32 %v13_v23, %v115_v24 }
   0x7   :  { %90 = vst [vmem:[%s345_s1] sm:$0xff] %v74_v11  ;;  %91 = vst [vmem:[%s345_s1 + $0x8] sm:$0xff] %v75_v16  ;;  %v14_v28 = vld [vmem:[%s344_s0 + $0x30] sm:$0xff]  ;;  %v15_v33 = vld [vmem:[%s344_s0 + $0x38] sm:$0xff] }
   0x8   :  { %v77_v26 = vmax.f32 %v44_v17, %v129_v15  ;;  %v116_v29 = vld [vmem:[%s344_s0 + $0xb0] sm:$0xff]  ;;  %92 = vst [vmem:[%s345_s1 + $0x10] sm:$0xff] %v76_v21  ;;  %v78_v31 = vmax.f32 %v45_v22, %v130_v20  ;;  %v117_v34 = vld [vmem:[%s344_s0 + $0xb8] sm:$0xff]  ;;  %v79_v36 = vmax.f32 %v46_v27, %v131_v25  ;;  %v16_v38 = vld [vmem:[%s344_s0 + $0x40] sm:$0xff] }
   0x9   :  { %v132_v30 = vld [vmem:[%s344_s0 + $0x130] sm:$0xff]  ;;  %v47_v32 = vmax.f32 %v14_v28, %v116_v29  ;;  %v133_v35 = vld [vmem:[%s344_s0 + $0x138] sm:$0xff]  ;;  %v48_v37 = vmax.f32 %v15_v33, %v117_v34  ;;  %v118_v39 = vld [vmem:[%s344_s0 + $0xc0] sm:$0xff] }
   0xa   :  { %93 = vst [vmem:[%s345_s1 + $0x18] sm:$0xff] %v77_v26  ;;  %v134_v40 = vld [vmem:[%s344_s0 + $0x140] sm:$0xff]  ;;  %94 = vst [vmem:[%s345_s1 + $0x20] sm:$0xff] %v78_v31  ;;  %v49_v42 = vmax.f32 %v16_v38, %v118_v39  ;;  %v17_v43 = vld [vmem:[%s344_s0 + $0x48] sm:$0xff] }
   0xb   :  { %v80_v41 = vmax.f32 %v47_v32, %v132_v30  ;;  %v119_v44 = vld [vmem:[%s344_s0 + $0xc8] sm:$0xff]  ;;  %95 = vst [vmem:[%s345_s1 + $0x28] sm:$0xff] %v79_v36  ;;  %v81_v46 = vmax.f32 %v48_v37, %v133_v35  ;;  %v18_v48 = vld [vmem:[%s344_s0 + $0x50] sm:$0xff]  ;;  %v19_v53 = vld [vmem:[%s344_s0 + $0x58] sm:$0xff] }
   0xc   :  { %v135_v45 = vld [vmem:[%s344_s0 + $0x148] sm:$0xff]  ;;  %v50_v47 = vmax.f32 %v17_v43, %v119_v44  ;;  %v120_v49 = vld [vmem:[%s344_s0 + $0xd0] sm:$0xff]  ;;  %v82_v51 = vmax.f32 %v49_v42, %v134_v40  ;;  %v121_v54 = vld [vmem:[%s344_s0 + $0xd8] sm:$0xff] }
   0xd   :  { %v136_v50 = vld [vmem:[%s344_s0 + $0x150] sm:$0xff]  ;;  %96 = vst [vmem:[%s345_s1 + $0x30] sm:$0xff] %v80_v41  ;;  %v51_v52 = vmax.f32 %v18_v48, %v120_v49  ;;  %v137_v55 = vld [vmem:[%s344_s0 + $0x158] sm:$0xff]  ;;  %97 = vst [vmem:[%s345_s1 + $0x38] sm:$0xff] %v81_v46  ;;  %v52_v57 = vmax.f32 %v19_v53, %v121_v54 }
   0xe   :  { %v83_v56 = vmax.f32 %v50_v47, %v135_v45  ;;  %v20_v58 = vld [vmem:[%s344_s0 + $0x60] sm:$0xff]  ;;  %98 = vst [vmem:[%s345_s1 + $0x40] sm:$0xff] %v82_v51  ;;  %v21_v63 = vld [vmem:[%s344_s0 + $0x68] sm:$0xff]  ;;  %v22_v4 = vld [vmem:[%s344_s0 + $0x70] sm:$0xff] }
   0xf   :  { %v122_v59 = vld [vmem:[%s344_s0 + $0xe0] sm:$0xff]  ;;  %v84_v61 = vmax.f32 %v51_v52, %v136_v50  ;;  %v123_v0 = vld [vmem:[%s344_s0 + $0xe8] sm:$0xff]  ;;  %v85_v2 = vmax.f32 %v52_v57, %v137_v55  ;;  %v124_v5 = vld [vmem:[%s344_s0 + $0xf0] sm:$0xff] }
  0x10   :  { %v138_v60 = vld [vmem:[%s344_s0 + $0x160] sm:$0xff]  ;;  %v53_v62 = vmax.f32 %v20_v58, %v122_v59  ;;  %v139_v1 = vld [vmem:[%s344_s0 + $0x168] sm:$0xff]  ;;  %99 = vst [vmem:[%s345_s1 + $0x48] sm:$0xff] %v83_v56  ;;  %v54_v3 = vmax.f32 %v21_v63, %v123_v0  ;;  %v140_v6 = vld [vmem:[%s344_s0 + $0x170] sm:$0xff]  ;;  %v55_v8 = vmax.f32 %v22_v4, %v124_v5 }
  0x11   :  { %100 = vst [vmem:[%s345_s1 + $0x50] sm:$0xff] %v84_v61  ;;  %v23_v9 = vld [vmem:[%s344_s0 + $0x78] sm:$0xff]  ;;  %101 = vst [vmem:[%s345_s1 + $0x58] sm:$0xff] %v85_v2 }
  0x12   :  { %v86_v7 = vmax.f32 %v53_v62, %v138_v60  ;;  %v125_v10 = vld [vmem:[%s344_s0 + $0xf8] sm:$0xff]  ;;  %v87_v12 = vmax.f32 %v54_v3, %v139_v1  ;;  %v88_v14 = vmax.f32 %v55_v8, %v140_v6 }
  0x13   :  { %v141_v11 = vld [vmem:[%s344_s0 + $0x178] sm:$0xff]  ;;  %v56_v13 = vmax.f32 %v23_v9, %v125_v10 }
  0x14   :  { %102 = vst [vmem:[%s345_s1 + $0x60] sm:$0xff] %v86_v7  ;;  %103 = vst [vmem:[%s345_s1 + $0x68] sm:$0xff] %v87_v12 }
  0x15   :  { %v89_v15 = vmax.f32 %v56_v13, %v141_v11  ;;  %104 = vst [vmem:[%s345_s1 + $0x70] sm:$0xff] %v88_v14 }
  0x17   :  { %105 = vst [vmem:[%s345_s1 + $0x78] sm:$0xff] %v89_v15 }

</bundles_post_ra>
